<compile_context>
chip_gen: v5e
topology: v5e:2x2
jax: 0.10.0
libtpu: 0.0.40
codegen_flags: <defaults>
</compile_context>

<pallas_src>
import math
from functools import partial

import jax
import jax.numpy as jnp
from jax import lax
from jax.experimental import pallas as pl
from jax.experimental.pallas import tpu as pltpu

# ----- tiny synthetic BERT config (bert.config.hidden_size / opt.polarities_dim) -----
VOCAB = 64
TYPE_VOCAB = 2
MAX_POS = 16
HIDDEN = 32
HEADS = 2
HEAD_DIM = HIDDEN // HEADS
LAYERS = 2
INTER = 64
POLARITIES = 3
LN_EPS = 1e-12
ATTN_SCALE = 1.0 / math.sqrt(HEAD_DIM)

PP = 128   # lane-dense padded logits width (sliced back to POLARITIES in the wrapper)

_VMEM = pl.BlockSpec(memory_space=pltpu.MemorySpace.VMEM)


# ---------------- fused Pallas kernel ----------------

def _rebert_kernel(emb_ref, mask_ref,
                   emb_g_ref, emb_b_ref,
                   wqkv_ref, bqkv_ref, wo_ref, bo_ref, ln1g_ref, ln1b_ref,
                   wi_ref, bi_ref, wo2_ref, bo2_ref, ln2g_ref, ln2b_ref,
                   pool_w_ref, pool_b_ref, dense_w_ref, dense_b_ref,
                   out_ref, *, batch, seq):
    f32 = jnp.float32
    bf16 = jnp.bfloat16
    gelu_c = math.sqrt(2.0 / math.pi)

    def ln(v, g, b):
        mean = jnp.mean(v, axis=-1, keepdims=True)
        vc = v - mean
        var = jnp.mean(vc * vc, axis=-1, keepdims=True)
        return vc * lax.rsqrt(var + LN_EPS) * g + b

    # additive attention mask, computed once and hoisted out of the layer loop
    madd = ((1.0 - mask_ref[...].astype(f32)) * -10000.0).reshape(batch, 1, seq)

    # embedding LayerNorm
    x0 = ln(emb_ref[...].astype(f32), emb_g_ref[...], emb_b_ref[...])     # (B*S, H)

    def layer(l, x):
        w_qkv = wqkv_ref[l]            # (HIDDEN, 3*HIDDEN)  bf16, cols [Q | K | V]
        b_qkv = bqkv_ref[l]            # (1, 3*HIDDEN)       f32  (Q part pre-scaled)
        w_o = wo_ref[l]                # (HIDDEN, HIDDEN)    bf16, rows h*Dh:(h+1)*Dh = head h
        b_o = bo_ref[l]                # (1, HIDDEN)         f32
        g1, be1 = ln1g_ref[l], ln1b_ref[l]
        w_i, b_i = wi_ref[l], bi_ref[l]
        w_o2, b_o2 = wo2_ref[l], bo2_ref[l]
        g2, be2 = ln2g_ref[l], ln2b_ref[l]

        # ---- fused Q/K/V projection: one MXU push per layer, f32 accumulation
        qkv = jnp.dot(x.astype(bf16), w_qkv, preferred_element_type=f32) + b_qkv
        qkv3 = qkv.reshape(batch, seq, 3 * HIDDEN)                         # (B, S, 96)

        # ---- self-attention: batched over B (one softmax per head per layer),
        #      per-head context accumulated directly into the output projection.
        attn = b_o                                                         # (1, H) broadcasts up
        for h in range(HEADS):
            q0 = h * HEAD_DIM
            qh = qkv3[:, :, q0:q0 + HEAD_DIM].astype(bf16)                 # (B, S, Dh)
            kh = qkv3[:, :, HIDDEN + q0:HIDDEN + q0 + HEAD_DIM].astype(bf16)
            vh = qkv3[:, :, 2 * HIDDEN + q0:2 * HIDDEN + q0 + HEAD_DIM].astype(bf16)

            s = jnp.einsum('bqd,bkd->bqk', qh, kh,
                           preferred_element_type=f32) + madd              # (B, S, S)
            s = s - jnp.max(s, axis=-1, keepdims=True)
            p = jnp.exp(s)
            p = p * pl.reciprocal(jnp.sum(p, axis=-1, keepdims=True), approx=True)

            ctx = jnp.einsum('bqk,bkd->bqd', p.astype(bf16), vh,
                             preferred_element_type=f32)                   # (B, S, Dh)
            attn = attn + jnp.dot(ctx.reshape(batch * seq, HEAD_DIM).astype(bf16),
                                  w_o[q0:q0 + HEAD_DIM, :],
                                  preferred_element_type=f32)              # (B*S, H)

        # ---- residual + LayerNorm
        x = ln(attn + x, g1, be1)

        # ---- FFN (GELU in f32), residual + LayerNorm
        inter = jnp.dot(x.astype(bf16), w_i, preferred_element_type=f32) + b_i
        # TODO(synk): erf-based exact GELU if bit-matching HF "gelu" is required
        inter = 0.5 * inter * (1.0 + jnp.tanh(
            gelu_c * (inter + 0.044715 * inter * inter * inter)))
        ffn = jnp.dot(inter.astype(bf16), w_o2, preferred_element_type=f32) + b_o2
        return ln(ffn + x, g2, be2)

    x = lax.fori_loop(0, LAYERS, layer, x0)

    # ---- pooler on token 0 of each sequence, then dense head
    pooled = x.reshape(batch, seq, HIDDEN)[:, 0, :]                        # (B, H)
    pooled = jnp.tanh(jnp.dot(pooled.astype(bf16), pool_w_ref[...],
                              preferred_element_type=f32) + pool_b_ref[...])
    # nn.Dropout: identity in eval/inference mode
    logits = jnp.dot(pooled.astype(bf16), dense_w_ref[...],
                     preferred_element_type=f32) + dense_b_ref[...]        # (B, PP)
    out_ref[...] = logits.astype(out_ref.dtype)


# ---------------- parameter init (deterministic, synthetic, PyTorch layout) ----------------

def init_params(key):
    def nrm(k, shape):
        return jax.random.normal(k, shape, jnp.float32) * 0.02

    keys = iter(jax.random.split(key, 128))
    p = {
        'word_emb': nrm(next(keys), (VOCAB, HIDDEN)),
        'pos_emb': nrm(next(keys), (MAX_POS, HIDDEN)),
        'type_emb': nrm(next(keys), (TYPE_VOCAB, HIDDEN)),
        'emb_ln_g': jnp.ones((HIDDEN,), jnp.float32),
        'emb_ln_b': jnp.zeros((HIDDEN,), jnp.float32),
        'pool_w': nrm(next(keys), (HIDDEN, HIDDEN)),
        'pool_b': jnp.zeros((HIDDEN,), jnp.float32),
        'dense_w': nrm(next(keys), (POLARITIES, HIDDEN)),   # nn.Linear(hidden_size, polarities_dim)
        'dense_b': jnp.zeros((POLARITIES,), jnp.float32),
        'layers': [],
    }
    for _ in range(LAYERS):
        lp = {
            'wq': nrm(next(keys), (HIDDEN, HIDDEN)), 'bq': jnp.zeros((HIDDEN,), jnp.float32),
            'wk': nrm(next(keys), (HIDDEN, HIDDEN)), 'bk': jnp.zeros((HIDDEN,), jnp.float32),
            'wv': nrm(next(keys), (HIDDEN, HIDDEN)), 'bv': jnp.zeros((HIDDEN,), jnp.float32),
            'wo': nrm(next(keys), (HIDDEN, HIDDEN)), 'bo': jnp.zeros((HIDDEN,), jnp.float32),
            'ln1_g': jnp.ones((HIDDEN,), jnp.float32), 'ln1_b': jnp.zeros((HIDDEN,), jnp.float32),
            'wi': nrm(next(keys), (INTER, HIDDEN)), 'bi': jnp.zeros((INTER,), jnp.float32),
            'wo2': nrm(next(keys), (HIDDEN, INTER)), 'bo2': jnp.zeros((HIDDEN,), jnp.float32),
            'ln2_g': jnp.ones((HIDDEN,), jnp.float32), 'ln2_b': jnp.zeros((HIDDEN,), jnp.float32),
        }
        p['layers'].append(lp)
    return p


def prepare_params(p):
    """One-time: transpose PyTorch (out,in) weights to (in,out), cast matmul
    weights to bf16 at their REAL (tight) shapes, fold 1/sqrt(head_dim) into the
    Q projection, stack per-layer weights, and lane-pad only the final logits
    projection (to keep the output store lane-dense)."""
    bf16 = jnp.bfloat16

    def tw(w_pt):          # PyTorch (out, in) -> (in, out)
        return w_pt.T

    def row(b):            # bias -> (1, n) f32
        return b.reshape(1, -1)

    prep = {
        'word_emb': p['word_emb'],
        'pos_emb': p['pos_emb'],
        'type_emb': p['type_emb'],
        'emb_ln_g': row(p['emb_ln_g']),
        'emb_ln_b': row(p['emb_ln_b']),
        'pool_w': tw(p['pool_w']).astype(bf16),                               # (32, 32) bf16
        'pool_b': row(p['pool_b']),
        'dense_w': jnp.pad(tw(p['dense_w']),
                           ((0, 0), (0, PP - POLARITIES))).astype(bf16),      # (32, 128) bf16
        'dense_b': jnp.pad(row(p['dense_b']), ((0, 0), (0, PP - POLARITIES))),
    }

    wqkv, bqkv, wo, bo, l1g, l1b, wi, bi, wo2, bo2, l2g, l2b = ([] for _ in range(12))
    for lp in p['layers']:
        # fold the attention scale into the Q projection (weights and bias)
        wqkv.append(jnp.concatenate(
            [tw(lp['wq']) * ATTN_SCALE, tw(lp['wk']), tw(lp['wv'])],
            axis=1).astype(bf16))                                             # (32, 96) bf16
        bqkv.append(row(jnp.concatenate(
            [lp['bq'] * ATTN_SCALE, lp['bk'], lp['bv']])))                    # (1, 96) f32

        wo.append(tw(lp['wo']).astype(bf16))                                  # (32, 32) bf16, per-head row blocks
        bo.append(row(lp['bo']))

        l1g.append(row(lp['ln1_g'])); l1b.append(row(lp['ln1_b']))
        wi.append(tw(lp['wi']).astype(bf16)); bi.append(row(lp['bi']))        # (32, 64) bf16
        wo2.append(tw(lp['wo2']).astype(bf16)); bo2.append(row(lp['bo2']))    # (64, 32) bf16
        l2g.append(row(lp['ln2_g'])); l2b.append(row(lp['ln2_b']))

    prep.update(
        wqkv=jnp.stack(wqkv), bqkv=jnp.stack(bqkv),
        wo=jnp.stack(wo), bo=jnp.stack(bo),
        ln1_g=jnp.stack(l1g), ln1_b=jnp.stack(l1b),
        wi=jnp.stack(wi), bi=jnp.stack(bi),
        wo2=jnp.stack(wo2), bo2=jnp.stack(bo2),
        ln2_g=jnp.stack(l2g), ln2_b=jnp.stack(l2b),
    )
    return prep


# ---------------- jitted forward (embedding gathers in JAX, everything else in one kernel) ----------------

@jax.jit
def re_bert_forward(prep, concat_bert_indices, concat_segments_indices, attention_mask):
    B, S = concat_bert_indices.shape
    h = (jnp.take(prep['word_emb'], concat_bert_indices, axis=0)
         + prep['pos_emb'][:S][None, :, :]
         + jnp.take(prep['type_emb'], concat_segments_indices, axis=0))       # (B, S, HIDDEN)
    emb = h.reshape(B * S, HIDDEN)
    mask = attention_mask.astype(jnp.float32)                                 # (B, S)

    logits_pad = pl.pallas_call(
        partial(_rebert_kernel, batch=B, seq=S),
        out_shape=jax.ShapeDtypeStruct((B, PP), jnp.float32),
        in_specs=[_VMEM] * 20,
        out_specs=_VMEM,
    )(emb, mask,
      prep['emb_ln_g'], prep['emb_ln_b'],
      prep['wqkv'], prep['bqkv'], prep['wo'], prep['bo'],
      prep['ln1_g'], prep['ln1_b'],
      prep['wi'], prep['bi'], prep['wo2'], prep['bo2'],
      prep['ln2_g'], prep['ln2_b'],
      prep['pool_w'], prep['pool_b'], prep['dense_w'], prep['dense_b'])

    return logits_pad[:, :POLARITIES]


if __name__ == "__main__":
    key = jax.random.PRNGKey(0)
    pkey, ikey = jax.random.split(key)
    params = prepare_params(init_params(pkey))

    B, S = 2, 8
    concat_bert_indices = jax.random.randint(ikey, (B, S), 0, VOCAB, dtype=jnp.int32)
    concat_segments_indices = jnp.concatenate(
        [jnp.zeros((B, S // 2), jnp.int32), jnp.ones((B, S // 2), jnp.int32)], axis=1)
    attention_mask = jnp.array([[1, 1, 1, 1, 1, 1, 1, 1],
                                [1, 1, 1, 1, 1, 1, 0, 0]], dtype=jnp.int32)

    logits = re_bert_forward(params, concat_bert_indices,
                             concat_segments_indices, attention_mask)
    jax.block_until_ready(logits)
    assert logits.shape == (B, POLARITIES)
    print("KERNEL_OK")
</pallas_src>

<mosaic_0001>
module attributes {stable_mosaic.version = 11 : i64} {
  func.func @_rebert_kernel(%arg0: memref<16x32xf32, #tpu.memory_space<vmem>>, %arg1: memref<2x8xf32, #tpu.memory_space<vmem>>, %arg2: memref<1x32xf32, #tpu.memory_space<vmem>>, %arg3: memref<1x32xf32, #tpu.memory_space<vmem>>, %arg4: memref<2x32x96xbf16, #tpu.memory_space<vmem>>, %arg5: memref<2x1x96xf32, #tpu.memory_space<vmem>>, %arg6: memref<2x32x32xbf16, #tpu.memory_space<vmem>>, %arg7: memref<2x1x32xf32, #tpu.memory_space<vmem>>, %arg8: memref<2x1x32xf32, #tpu.memory_space<vmem>>, %arg9: memref<2x1x32xf32, #tpu.memory_space<vmem>>, %arg10: memref<2x32x64xbf16, #tpu.memory_space<vmem>>, %arg11: memref<2x1x64xf32, #tpu.memory_space<vmem>>, %arg12: memref<2x64x32xbf16, #tpu.memory_space<vmem>>, %arg13: memref<2x1x32xf32, #tpu.memory_space<vmem>>, %arg14: memref<2x1x32xf32, #tpu.memory_space<vmem>>, %arg15: memref<2x1x32xf32, #tpu.memory_space<vmem>>, %arg16: memref<32x32xbf16, #tpu.memory_space<vmem>>, %arg17: memref<1x32xf32, #tpu.memory_space<vmem>>, %arg18: memref<32x128xbf16, #tpu.memory_space<vmem>>, %arg19: memref<1x128xf32, #tpu.memory_space<vmem>>, %arg20: memref<2x128xf32, #tpu.memory_space<vmem>>) attributes {dimension_semantics = [], scalar_prefetch = 0 : i64, scratch_operands = 0 : i64, tpu.core_type = #tpu.core_type<tc>} {
    %c0 = arith.constant 0 : index
    %c0_0 = arith.constant 0 : index
    %0 = vector.load %arg1[%c0, %c0_0] : memref<2x8xf32, #tpu.memory_space<vmem>>, vector<2x8xf32>
    %cst = arith.constant 1.000000e+00 : f32
    %1 = vector.broadcast %cst : f32 to vector<2x8xf32>
    %2 = arith.subf %1, %0 : vector<2x8xf32>
    %cst_1 = arith.constant -1.000000e+04 : f32
    %3 = vector.broadcast %cst_1 : f32 to vector<2x8xf32>
    %4 = arith.mulf %2, %3 : vector<2x8xf32>
    %5 = vector.shape_cast %4 : vector<2x8xf32> to vector<2x1x8xf32>
    %c0_2 = arith.constant 0 : index
    %c0_3 = arith.constant 0 : index
    %6 = vector.load %arg0[%c0_2, %c0_3] : memref<16x32xf32, #tpu.memory_space<vmem>>, vector<16x32xf32>
    %c0_4 = arith.constant 0 : index
    %c0_5 = arith.constant 0 : index
    %7 = vector.load %arg2[%c0_4, %c0_5] : memref<1x32xf32, #tpu.memory_space<vmem>>, vector<1x32xf32>
    %c0_6 = arith.constant 0 : index
    %c0_7 = arith.constant 0 : index
    %8 = vector.load %arg3[%c0_6, %c0_7] : memref<1x32xf32, #tpu.memory_space<vmem>>, vector<1x32xf32>
    %cst_8 = arith.constant dense<0.000000e+00> : vector<16xf32>
    %9 = vector.multi_reduction <add>, %6, %cst_8 [1] : vector<16x32xf32> to vector<16xf32>
    %10 = vector.shape_cast %9 : vector<16xf32> to vector<16x1xf32>
    %cst_9 = arith.constant 3.200000e+01 : f32
    %11 = vector.broadcast %cst_9 : f32 to vector<16x1xf32>
    %12 = arith.divf %10, %11 : vector<16x1xf32>
    %13 = vector.broadcast %12 : vector<16x1xf32> to vector<16x32xf32>
    %14 = arith.subf %6, %13 : vector<16x32xf32>
    %15 = arith.mulf %14, %14 : vector<16x32xf32>
    %cst_10 = arith.constant dense<0.000000e+00> : vector<16xf32>
    %16 = vector.multi_reduction <add>, %15, %cst_10 [1] : vector<16x32xf32> to vector<16xf32>
    %17 = vector.shape_cast %16 : vector<16xf32> to vector<16x1xf32>
    %cst_11 = arith.constant 3.200000e+01 : f32
    %18 = vector.broadcast %cst_11 : f32 to vector<16x1xf32>
    %19 = arith.divf %17, %18 : vector<16x1xf32>
    %cst_12 = arith.constant 9.99999996E-13 : f32
    %20 = vector.broadcast %cst_12 : f32 to vector<16x1xf32>
    %21 = arith.addf %19, %20 : vector<16x1xf32>
    %22 = math.rsqrt %21 : vector<16x1xf32>
    %23 = vector.broadcast %22 : vector<16x1xf32> to vector<16x32xf32>
    %24 = arith.mulf %14, %23 : vector<16x32xf32>
    %25 = vector.broadcast %7 : vector<1x32xf32> to vector<16x32xf32>
    %26 = arith.mulf %24, %25 : vector<16x32xf32>
    %27 = vector.broadcast %8 : vector<1x32xf32> to vector<16x32xf32>
    %28 = arith.addf %26, %27 : vector<16x32xf32>
    %c0_i32 = arith.constant 0 : i32
    %c2_i32 = arith.constant 2 : i32
    %29 = arith.addi %c0_i32, %c2_i32 : i32
    %c1_i32 = arith.constant 1 : i32
    %30 = scf.for %arg21 = %c0_i32 to %29 step %c1_i32 iter_args(%arg22 = %28) -> (vector<16x32xf32>)  : i32 {
      %48 = arith.index_cast %arg21 : i32 to index
      %c0_26 = arith.constant 0 : index
      %c0_27 = arith.constant 0 : index
      %49 = vector.load %arg4[%48, %c0_26, %c0_27] : memref<2x32x96xbf16, #tpu.memory_space<vmem>>, vector<1x32x96xbf16>
      %50 = vector.shape_cast %49 : vector<1x32x96xbf16> to vector<32x96xbf16>
      %51 = arith.index_cast %arg21 : i32 to index
      %c0_28 = arith.constant 0 : index
      %c0_29 = arith.constant 0 : index
      %52 = vector.load %arg5[%51, %c0_28, %c0_29] : memref<2x1x96xf32, #tpu.memory_space<vmem>>, vector<1x1x96xf32>
      %53 = vector.shape_cast %52 : vector<1x1x96xf32> to vector<1x96xf32>
      %54 = arith.index_cast %arg21 : i32 to index
      %c0_30 = arith.constant 0 : index
      %c0_31 = arith.constant 0 : index
      %55 = vector.load %arg6[%54, %c0_30, %c0_31] : memref<2x32x32xbf16, #tpu.memory_space<vmem>>, vector<1x32x32xbf16>
      %56 = vector.shape_cast %55 : vector<1x32x32xbf16> to vector<32x32xbf16>
      %57 = arith.index_cast %arg21 : i32 to index
      %c0_32 = arith.constant 0 : index
      %c0_33 = arith.constant 0 : index
      %58 = vector.load %arg7[%57, %c0_32, %c0_33] : memref<2x1x32xf32, #tpu.memory_space<vmem>>, vector<1x1x32xf32>
      %59 = vector.shape_cast %58 : vector<1x1x32xf32> to vector<1x32xf32>
      %60 = arith.index_cast %arg21 : i32 to index
      %c0_34 = arith.constant 0 : index
      %c0_35 = arith.constant 0 : index
      %61 = vector.load %arg8[%60, %c0_34, %c0_35] : memref<2x1x32xf32, #tpu.memory_space<vmem>>, vector<1x1x32xf32>
      %62 = vector.shape_cast %61 : vector<1x1x32xf32> to vector<1x32xf32>
      %63 = arith.index_cast %arg21 : i32 to index
      %c0_36 = arith.constant 0 : index
      %c0_37 = arith.constant 0 : index
      %64 = vector.load %arg9[%63, %c0_36, %c0_37] : memref<2x1x32xf32, #tpu.memory_space<vmem>>, vector<1x1x32xf32>
      %65 = vector.shape_cast %64 : vector<1x1x32xf32> to vector<1x32xf32>
      %66 = arith.index_cast %arg21 : i32 to index
      %c0_38 = arith.constant 0 : index
      %c0_39 = arith.constant 0 : index
      %67 = vector.load %arg10[%66, %c0_38, %c0_39] : memref<2x32x64xbf16, #tpu.memory_space<vmem>>, vector<1x32x64xbf16>
      %68 = vector.shape_cast %67 : vector<1x32x64xbf16> to vector<32x64xbf16>
      %69 = arith.index_cast %arg21 : i32 to index
      %c0_40 = arith.constant 0 : index
      %c0_41 = arith.constant 0 : index
      %70 = vector.load %arg11[%69, %c0_40, %c0_41] : memref<2x1x64xf32, #tpu.memory_space<vmem>>, vector<1x1x64xf32>
      %71 = vector.shape_cast %70 : vector<1x1x64xf32> to vector<1x64xf32>
      %72 = arith.index_cast %arg21 : i32 to index
      %c0_42 = arith.constant 0 : index
      %c0_43 = arith.constant 0 : index
      %73 = vector.load %arg12[%72, %c0_42, %c0_43] : memref<2x64x32xbf16, #tpu.memory_space<vmem>>, vector<1x64x32xbf16>
      %74 = vector.shape_cast %73 : vector<1x64x32xbf16> to vector<64x32xbf16>
      %75 = arith.index_cast %arg21 : i32 to index
      %c0_44 = arith.constant 0 : index
      %c0_45 = arith.constant 0 : index
      %76 = vector.load %arg13[%75, %c0_44, %c0_45] : memref<2x1x32xf32, #tpu.memory_space<vmem>>, vector<1x1x32xf32>
      %77 = vector.shape_cast %76 : vector<1x1x32xf32> to vector<1x32xf32>
      %78 = arith.index_cast %arg21 : i32 to index
      %c0_46 = arith.constant 0 : index
      %c0_47 = arith.constant 0 : index
      %79 = vector.load %arg14[%78, %c0_46, %c0_47] : memref<2x1x32xf32, #tpu.memory_space<vmem>>, vector<1x1x32xf32>
      %80 = vector.shape_cast %79 : vector<1x1x32xf32> to vector<1x32xf32>
      %81 = arith.index_cast %arg21 : i32 to index
      %c0_48 = arith.constant 0 : index
      %c0_49 = arith.constant 0 : index
      %82 = vector.load %arg15[%81, %c0_48, %c0_49] : memref<2x1x32xf32, #tpu.memory_space<vmem>>, vector<1x1x32xf32>
      %83 = vector.shape_cast %82 : vector<1x1x32xf32> to vector<1x32xf32>
      %84 = arith.truncf %arg22 : vector<16x32xf32> to vector<16x32xbf16>
      %cst_50 = arith.constant dense<0.000000e+00> : vector<16x96xf32>
      %85 = tpu.matmul %84, %50, %cst_50 {dimension_numbers = #tpu.dot_dimension_numbers<[1], [0], [0], [1], [0, 0, 1, 1], [], []>} : vector<16x32xbf16>, vector<32x96xbf16>, vector<16x96xf32> -> vector<16x96xf32>
      %86 = vector.broadcast %53 : vector<1x96xf32> to vector<16x96xf32>
      %87 = arith.addf %85, %86 : vector<16x96xf32>
      %88 = vector.shape_cast %87 : vector<16x96xf32> to vector<2x8x96xf32>
      %89 = vector.extract_strided_slice %88 {offsets = [0, 0, 0], sizes = [2, 8, 16], strides = [1, 1, 1]} : vector<2x8x96xf32> to vector<2x8x16xf32>
      %90 = arith.truncf %89 : vector<2x8x16xf32> to vector<2x8x16xbf16>
      %91 = vector.extract_strided_slice %88 {offsets = [0, 0, 32], sizes = [2, 8, 16], strides = [1, 1, 1]} : vector<2x8x96xf32> to vector<2x8x16xf32>
      %92 = arith.truncf %91 : vector<2x8x16xf32> to vector<2x8x16xbf16>
      %93 = vector.extract_strided_slice %88 {offsets = [0, 0, 64], sizes = [2, 8, 16], strides = [1, 1, 1]} : vector<2x8x96xf32> to vector<2x8x16xf32>
      %94 = arith.truncf %93 : vector<2x8x16xf32> to vector<2x8x16xbf16>
      "tpu.trace_start"() <{level = 10 : i32, message = "bqd,bkd->bqk"}> : () -> ()
      %cst_51 = arith.constant dense<0.000000e+00> : vector<2x8x8xf32>
      %95 = tpu.matmul %90, %92, %cst_51 {dimension_numbers = #tpu.dot_dimension_numbers<[2], [2], [1], [1], [0, 0, 0, 1, 1, 1], [0], [0]>} : vector<2x8x16xbf16>, vector<2x8x16xbf16>, vector<2x8x8xf32> -> vector<2x8x8xf32>
      "tpu.trace_stop"() : () -> ()
      %96 = vector.broadcast %5 : vector<2x1x8xf32> to vector<2x8x8xf32>
      %97 = arith.addf %95, %96 : vector<2x8x8xf32>
      %cst_52 = arith.constant dense<0xFF800000> : vector<2x8xf32>
      %98 = vector.multi_reduction <maximumf>, %97, %cst_52 [2] : vector<2x8x8xf32> to vector<2x8xf32>
      %99 = vector.shape_cast %98 : vector<2x8xf32> to vector<2x8x1xf32>
      %100 = vector.broadcast %99 : vector<2x8x1xf32> to vector<2x8x8xf32>
      %101 = arith.subf %97, %100 : vector<2x8x8xf32>
      %102 = math.exp %101 : vector<2x8x8xf32>
      %cst_53 = arith.constant dense<0.000000e+00> : vector<2x8xf32>
      %103 = vector.multi_reduction <add>, %102, %cst_53 [2] : vector<2x8x8xf32> to vector<2x8xf32>
      %104 = vector.shape_cast %103 : vector<2x8xf32> to vector<2x8x1xf32>
      %105 = tpu.reciprocal %104 {approx = true} : vector<2x8x1xf32> -> vector<2x8x1xf32>
      %106 = vector.broadcast %105 : vector<2x8x1xf32> to vector<2x8x8xf32>
      %107 = arith.mulf %102, %106 : vector<2x8x8xf32>
      %108 = arith.truncf %107 : vector<2x8x8xf32> to vector<2x8x8xbf16>
      "tpu.trace_start"() <{level = 10 : i32, message = "bqk,bkd->bqd"}> : () -> ()
      %cst_54 = arith.constant dense<0.000000e+00> : vector<2x8x16xf32>
      %109 = tpu.matmul %108, %94, %cst_54 {dimension_numbers = #tpu.dot_dimension_numbers<[2], [1], [1], [2], [0, 0, 0, 1, 1, 2], [0], [0]>} : vector<2x8x8xbf16>, vector<2x8x16xbf16>, vector<2x8x16xf32> -> vector<2x8x16xf32>
      "tpu.trace_stop"() : () -> ()
      %110 = vector.shape_cast %109 : vector<2x8x16xf32> to vector<16x16xf32>
      %111 = arith.truncf %110 : vector<16x16xf32> to vector<16x16xbf16>
      %112 = vector.extract_strided_slice %56 {offsets = [0, 0], sizes = [16, 32], strides = [1, 1]} : vector<32x32xbf16> to vector<16x32xbf16>
      %cst_55 = arith.constant dense<0.000000e+00> : vector<16x32xf32>
      %113 = tpu.matmul %111, %112, %cst_55 {dimension_numbers = #tpu.dot_dimension_numbers<[1], [0], [0], [1], [0, 0, 1, 1], [], []>} : vector<16x16xbf16>, vector<16x32xbf16>, vector<16x32xf32> -> vector<16x32xf32>
      %114 = vector.broadcast %59 : vector<1x32xf32> to vector<16x32xf32>
      %115 = arith.addf %114, %113 : vector<16x32xf32>
      %116 = vector.extract_strided_slice %88 {offsets = [0, 0, 16], sizes = [2, 8, 16], strides = [1, 1, 1]} : vector<2x8x96xf32> to vector<2x8x16xf32>
      %117 = arith.truncf %116 : vector<2x8x16xf32> to vector<2x8x16xbf16>
      %118 = vector.extract_strided_slice %88 {offsets = [0, 0, 48], sizes = [2, 8, 16], strides = [1, 1, 1]} : vector<2x8x96xf32> to vector<2x8x16xf32>
      %119 = arith.truncf %118 : vector<2x8x16xf32> to vector<2x8x16xbf16>
      %120 = vector.extract_strided_slice %88 {offsets = [0, 0, 80], sizes = [2, 8, 16], strides = [1, 1, 1]} : vector<2x8x96xf32> to vector<2x8x16xf32>
      %121 = arith.truncf %120 : vector<2x8x16xf32> to vector<2x8x16xbf16>
      "tpu.trace_start"() <{level = 10 : i32, message = "bqd,bkd->bqk"}> : () -> ()
      %cst_56 = arith.constant dense<0.000000e+00> : vector<2x8x8xf32>
      %122 = tpu.matmul %117, %119, %cst_56 {dimension_numbers = #tpu.dot_dimension_numbers<[2], [2], [1], [1], [0, 0, 0, 1, 1, 1], [0], [0]>} : vector<2x8x16xbf16>, vector<2x8x16xbf16>, vector<2x8x8xf32> -> vector<2x8x8xf32>
      "tpu.trace_stop"() : () -> ()
      %123 = vector.broadcast %5 : vector<2x1x8xf32> to vector<2x8x8xf32>
      %124 = arith.addf %122, %123 : vector<2x8x8xf32>
      %cst_57 = arith.constant dense<0xFF800000> : vector<2x8xf32>
      %125 = vector.multi_reduction <maximumf>, %124, %cst_57 [2] : vector<2x8x8xf32> to vector<2x8xf32>
      %126 = vector.shape_cast %125 : vector<2x8xf32> to vector<2x8x1xf32>
      %127 = vector.broadcast %126 : vector<2x8x1xf32> to vector<2x8x8xf32>
      %128 = arith.subf %124, %127 : vector<2x8x8xf32>
      %129 = math.exp %128 : vector<2x8x8xf32>
      %cst_58 = arith.constant dense<0.000000e+00> : vector<2x8xf32>
      %130 = vector.multi_reduction <add>, %129, %cst_58 [2] : vector<2x8x8xf32> to vector<2x8xf32>
      %131 = vector.shape_cast %130 : vector<2x8xf32> to vector<2x8x1xf32>
      %132 = tpu.reciprocal %131 {approx = true} : vector<2x8x1xf32> -> vector<2x8x1xf32>
      %133 = vector.broadcast %132 : vector<2x8x1xf32> to vector<2x8x8xf32>
      %134 = arith.mulf %129, %133 : vector<2x8x8xf32>
      %135 = arith.truncf %134 : vector<2x8x8xf32> to vector<2x8x8xbf16>
      "tpu.trace_start"() <{level = 10 : i32, message = "bqk,bkd->bqd"}> : () -> ()
      %cst_59 = arith.constant dense<0.000000e+00> : vector<2x8x16xf32>
      %136 = tpu.matmul %135, %121, %cst_59 {dimension_numbers = #tpu.dot_dimension_numbers<[2], [1], [1], [2], [0, 0, 0, 1, 1, 2], [0], [0]>} : vector<2x8x8xbf16>, vector<2x8x16xbf16>, vector<2x8x16xf32> -> vector<2x8x16xf32>
      "tpu.trace_stop"() : () -> ()
      %137 = vector.shape_cast %136 : vector<2x8x16xf32> to vector<16x16xf32>
      %138 = arith.truncf %137 : vector<16x16xf32> to vector<16x16xbf16>
      %139 = vector.extract_strided_slice %56 {offsets = [16, 0], sizes = [16, 32], strides = [1, 1]} : vector<32x32xbf16> to vector<16x32xbf16>
      %cst_60 = arith.constant dense<0.000000e+00> : vector<16x32xf32>
      %140 = tpu.matmul %138, %139, %cst_60 {dimension_numbers = #tpu.dot_dimension_numbers<[1], [0], [0], [1], [0, 0, 1, 1], [], []>} : vector<16x16xbf16>, vector<16x32xbf16>, vector<16x32xf32> -> vector<16x32xf32>
      %141 = arith.addf %115, %140 : vector<16x32xf32>
      %142 = arith.addf %141, %arg22 : vector<16x32xf32>
      %cst_61 = arith.constant dense<0.000000e+00> : vector<16xf32>
      %143 = vector.multi_reduction <add>, %142, %cst_61 [1] : vector<16x32xf32> to vector<16xf32>
      %144 = vector.shape_cast %143 : vector<16xf32> to vector<16x1xf32>
      %cst_62 = arith.constant 3.200000e+01 : f32
      %145 = vector.broadcast %cst_62 : f32 to vector<16x1xf32>
      %146 = arith.divf %144, %145 : vector<16x1xf32>
      %147 = vector.broadcast %146 : vector<16x1xf32> to vector<16x32xf32>
      %148 = arith.subf %142, %147 : vector<16x32xf32>
      %149 = arith.mulf %148, %148 : vector<16x32xf32>
      %cst_63 = arith.constant dense<0.000000e+00> : vector<16xf32>
      %150 = vector.multi_reduction <add>, %149, %cst_63 [1] : vector<16x32xf32> to vector<16xf32>
      %151 = vector.shape_cast %150 : vector<16xf32> to vector<16x1xf32>
      %cst_64 = arith.constant 3.200000e+01 : f32
      %152 = vector.broadcast %cst_64 : f32 to vector<16x1xf32>
      %153 = arith.divf %151, %152 : vector<16x1xf32>
      %cst_65 = arith.constant 9.99999996E-13 : f32
      %154 = vector.broadcast %cst_65 : f32 to vector<16x1xf32>
      %155 = arith.addf %153, %154 : vector<16x1xf32>
      %156 = math.rsqrt %155 : vector<16x1xf32>
      %157 = vector.broadcast %156 : vector<16x1xf32> to vector<16x32xf32>
      %158 = arith.mulf %148, %157 : vector<16x32xf32>
      %159 = vector.broadcast %62 : vector<1x32xf32> to vector<16x32xf32>
      %160 = arith.mulf %158, %159 : vector<16x32xf32>
      %161 = vector.broadcast %65 : vector<1x32xf32> to vector<16x32xf32>
      %162 = arith.addf %160, %161 : vector<16x32xf32>
      %163 = arith.truncf %162 : vector<16x32xf32> to vector<16x32xbf16>
      %cst_66 = arith.constant dense<0.000000e+00> : vector<16x64xf32>
      %164 = tpu.matmul %163, %68, %cst_66 {dimension_numbers = #tpu.dot_dimension_numbers<[1], [0], [0], [1], [0, 0, 1, 1], [], []>} : vector<16x32xbf16>, vector<32x64xbf16>, vector<16x64xf32> -> vector<16x64xf32>
      %165 = vector.broadcast %71 : vector<1x64xf32> to vector<16x64xf32>
      %166 = arith.addf %164, %165 : vector<16x64xf32>
      %cst_67 = arith.constant 5.000000e-01 : f32
      %167 = vector.broadcast %cst_67 : f32 to vector<16x64xf32>
      %168 = arith.mulf %167, %166 : vector<16x64xf32>
      %cst_68 = arith.constant 4.471500e-02 : f32
      %169 = vector.broadcast %cst_68 : f32 to vector<16x64xf32>
      %170 = arith.mulf %169, %166 : vector<16x64xf32>
      %171 = arith.mulf %170, %166 : vector<16x64xf32>
      %172 = arith.mulf %171, %166 : vector<16x64xf32>
      %173 = arith.addf %166, %172 : vector<16x64xf32>
      %cst_69 = arith.constant 0.797884583 : f32
      %174 = vector.broadcast %cst_69 : f32 to vector<16x64xf32>
      %175 = arith.mulf %174, %173 : vector<16x64xf32>
      %176 = math.tanh %175 : vector<16x64xf32>
      %cst_70 = arith.constant 1.000000e+00 : f32
      %177 = vector.broadcast %cst_70 : f32 to vector<16x64xf32>
      %178 = arith.addf %177, %176 : vector<16x64xf32>
      %179 = arith.mulf %168, %178 : vector<16x64xf32>
      %180 = arith.truncf %179 : vector<16x64xf32> to vector<16x64xbf16>
      %cst_71 = arith.constant dense<0.000000e+00> : vector<16x32xf32>
      %181 = tpu.matmul %180, %74, %cst_71 {dimension_numbers = #tpu.dot_dimension_numbers<[1], [0], [0], [1], [0, 0, 1, 1], [], []>} : vector<16x64xbf16>, vector<64x32xbf16>, vector<16x32xf32> -> vector<16x32xf32>
      %182 = vector.broadcast %77 : vector<1x32xf32> to vector<16x32xf32>
      %183 = arith.addf %181, %182 : vector<16x32xf32>
      %184 = arith.addf %183, %162 : vector<16x32xf32>
      %cst_72 = arith.constant dense<0.000000e+00> : vector<16xf32>
      %185 = vector.multi_reduction <add>, %184, %cst_72 [1] : vector<16x32xf32> to vector<16xf32>
      %186 = vector.shape_cast %185 : vector<16xf32> to vector<16x1xf32>
      %cst_73 = arith.constant 3.200000e+01 : f32
      %187 = vector.broadcast %cst_73 : f32 to vector<16x1xf32>
      %188 = arith.divf %186, %187 : vector<16x1xf32>
      %189 = vector.broadcast %188 : vector<16x1xf32> to vector<16x32xf32>
      %190 = arith.subf %184, %189 : vector<16x32xf32>
      %191 = arith.mulf %190, %190 : vector<16x32xf32>
      %cst_74 = arith.constant dense<0.000000e+00> : vector<16xf32>
      %192 = vector.multi_reduction <add>, %191, %cst_74 [1] : vector<16x32xf32> to vector<16xf32>
      %193 = vector.shape_cast %192 : vector<16xf32> to vector<16x1xf32>
      %cst_75 = arith.constant 3.200000e+01 : f32
      %194 = vector.broadcast %cst_75 : f32 to vector<16x1xf32>
      %195 = arith.divf %193, %194 : vector<16x1xf32>
      %cst_76 = arith.constant 9.99999996E-13 : f32
      %196 = vector.broadcast %cst_76 : f32 to vector<16x1xf32>
      %197 = arith.addf %195, %196 : vector<16x1xf32>
      %198 = math.rsqrt %197 : vector<16x1xf32>
      %199 = vector.broadcast %198 : vector<16x1xf32> to vector<16x32xf32>
      %200 = arith.mulf %190, %199 : vector<16x32xf32>
      %201 = vector.broadcast %80 : vector<1x32xf32> to vector<16x32xf32>
      %202 = arith.mulf %200, %201 : vector<16x32xf32>
      %203 = vector.broadcast %83 : vector<1x32xf32> to vector<16x32xf32>
      %204 = arith.addf %202, %203 : vector<16x32xf32>
      scf.yield %204 : vector<16x32xf32>
    }
    %c2_i32_13 = arith.constant 2 : i32
    %31 = vector.shape_cast %30 : vector<16x32xf32> to vector<2x8x32xf32>
    %32 = vector.extract_strided_slice %31 {offsets = [0, 0, 0], sizes = [2, 1, 32], strides = [1, 1, 1]} : vector<2x8x32xf32> to vector<2x1x32xf32>
    %33 = vector.shape_cast %32 : vector<2x1x32xf32> to vector<2x32xf32>
    %34 = arith.truncf %33 : vector<2x32xf32> to vector<2x32xbf16>
    %c0_14 = arith.constant 0 : index
    %c0_15 = arith.constant 0 : index
    %35 = vector.load %arg16[%c0_14, %c0_15] : memref<32x32xbf16, #tpu.memory_space<vmem>>, vector<32x32xbf16>
    %cst_16 = arith.constant dense<0.000000e+00> : vector<2x32xf32>
    %36 = tpu.matmul %34, %35, %cst_16 {dimension_numbers = #tpu.dot_dimension_numbers<[1], [0], [0], [1], [0, 0, 1, 1], [], []>} : vector<2x32xbf16>, vector<32x32xbf16>, vector<2x32xf32> -> vector<2x32xf32>
    %c0_17 = arith.constant 0 : index
    %c0_18 = arith.constant 0 : index
    %37 = vector.load %arg17[%c0_17, %c0_18] : memref<1x32xf32, #tpu.memory_space<vmem>>, vector<1x32xf32>
    %38 = vector.broadcast %37 : vector<1x32xf32> to vector<2x32xf32>
    %39 = arith.addf %36, %38 : vector<2x32xf32>
    %40 = math.tanh %39 : vector<2x32xf32>
    %41 = arith.truncf %40 : vector<2x32xf32> to vector<2x32xbf16>
    %c0_19 = arith.constant 0 : index
    %c0_20 = arith.constant 0 : index
    %42 = vector.load %arg18[%c0_19, %c0_20] : memref<32x128xbf16, #tpu.memory_space<vmem>>, vector<32x128xbf16>
    %cst_21 = arith.constant dense<0.000000e+00> : vector<2x128xf32>
    %43 = tpu.matmul %41, %42, %cst_21 {dimension_numbers = #tpu.dot_dimension_numbers<[1], [0], [0], [1], [0, 0, 1, 1], [], []>} : vector<2x32xbf16>, vector<32x128xbf16>, vector<2x128xf32> -> vector<2x128xf32>
    %c0_22 = arith.constant 0 : index
    %c0_23 = arith.constant 0 : index
    %44 = vector.load %arg19[%c0_22, %c0_23] : memref<1x128xf32, #tpu.memory_space<vmem>>, vector<1x128xf32>
    %45 = vector.broadcast %44 : vector<1x128xf32> to vector<2x128xf32>
    %46 = arith.addf %43, %45 : vector<2x128xf32>
    %c0_24 = arith.constant 0 : index
    %c0_25 = arith.constant 0 : index
    %47 = vector.load %arg20[%c0_24, %c0_25] : memref<2x128xf32, #tpu.memory_space<vmem>>, vector<2x128xf32>
    tpu.vector_store %arg20[%c0_24, %c0_25], %46 {strides = array<i32>} : memref<2x128xf32, #tpu.memory_space<vmem>>, vector<2x128xf32>,
    return
  }
}

</mosaic_0001>

<bundles_post_ra>
// kernel: re_bert_forward.1
= control target key start
LH: loop header
LB: loop body
LE: loop exit
PB: predicated region body
PF: predicated region fallthrough
CT: control target
= control target key end

     0   :  { %s1414_s0 = inlined_call_operand.vmem [shape: f32[16,32], index: 0, kind: input, shape index: {}]   ;;  %s1415_s1 = inlined_call_operand.vmem [shape: f32[2,8], index: 1, kind: input, shape index: {}]   ;;  %s1416_s2 = inlined_call_operand.vmem [shape: f32[1,32], index: 2, kind: input, shape index: {}]   ;;  %s1417_s3 = inlined_call_operand.vmem [shape: f32[1,32], index: 3, kind: input, shape index: {}]   ;;  %s1418_s4 = inlined_call_operand.vmem [shape: bf16[2,32,96], index: 4, kind: input, shape index: {}]   ;;  %s1419_s5 = inlined_call_operand.vmem [shape: f32[2,1,96], index: 5, kind: input, shape index: {}]   ;;  %s1420_s6 = inlined_call_operand.vmem [shape: bf16[2,32,32], index: 6, kind: input, shape index: {}]   ;;  %s1421_s7 = inlined_call_operand.vmem [shape: f32[2,1,32], index: 7, kind: input, shape index: {}]   ;;  %s1422_s8 = inlined_call_operand.vmem [shape: f32[2,1,32], index: 8, kind: input, shape index: {}]   ;;  %s1423_s9 = inlined_call_operand.vmem [shape: f32[2,1,32], index: 9, kind: input, shape index: {}]   ;;  %s1424_s10 = inlined_call_operand.vmem [shape: bf16[2,32,64], index: 10, kind: input, shape index: {}]   ;;  %s1425_s11 = inlined_call_operand.vmem [shape: f32[2,1,64], index: 11, kind: input, shape index: {}]   ;;  %s1426_s12 = inlined_call_operand.vmem [shape: bf16[2,64,32], index: 12, kind: input, shape index: {}]   ;;  %s1427_s13 = inlined_call_operand.vmem [shape: f32[2,1,32], index: 13, kind: input, shape index: {}]   ;;  %s1428_s14 = inlined_call_operand.vmem [shape: f32[2,1,32], index: 14, kind: input, shape index: {}]   ;;  %s1429_s15 = inlined_call_operand.vmem [shape: f32[2,1,32], index: 15, kind: input, shape index: {}]   ;;  %s1430_s16 = inlined_call_operand.vmem [shape: bf16[32,32], index: 16, kind: input, shape index: {}]   ;;  %s1431_s17 = inlined_call_operand.vmem [shape: f32[1,32], index: 17, kind: input, shape index: {}]   ;;  %s1432_s18 = inlined_call_operand.vmem [shape: bf16[32,128], index: 18, kind: input, shape index: {}]   ;;  %s1433_s19 = inlined_call_operand.vmem [shape: f32[1,128], index: 19, kind: input, shape index: {}]   ;;  %s1434_s20 = inlined_call_operand.hbm [shape: f32[2,128], index: 20, kind: output, shape index: {}]  }
   0x1   :  { %1436 = sst [smem:[#allocation5_spill]] %s1414_s0 }
   0x2   :  { %1437 = sst [smem:[#allocation6_spill]] %s1415_s1 }
   0x3   :  { %1438 = sst [smem:[#allocation7_spill]] %s1416_s2 }
   0x4   :  { %1439 = sst [smem:[#allocation8_spill]] %s1417_s3 }
   0x5   :  { %1440 = sst [smem:[#allocation9_spill]] %s1418_s4 }
   0x6   :  { %s1441_s23 = sld [smem:[#allocation5_spill]]  ;;  %vm76_vm0 = vcmask 261120  }
   0xc   :  { %v72_v0 = vld [vmem:[%s1441_s23] sm:$0xff] }
   0xd   :  { %v77_v1 = vsel %vm76_vm0, %v72_v0, 0.0 }
   0xe   :  { %25 = vsyncpa [#allocation3], 0  ;;  %78 = vadd.xlane.f32.xlu0 %v77_v1  ;;  %v73_v2 = vld [vmem:[%s1441_s23 + $0x8] sm:$0xff]  ;;  %v1076_v4 = vmov 32.0   ;;  %s1442_s26 = sld [smem:[#allocation6_spill]]  ;;  %s1220_s21 = smov 0  }
   0xf   :  { %v80_v3 = vsel %vm76_vm0, %v73_v2, 0.0  ;;  %980 = vrcp.f32 %v1076_v4  ;;  %s1443_s4 = sld [smem:[#allocation7_spill]] }
  0x10   :  { %s1444_s0 = sld [smem:[#allocation8_spill]] }
  0x14   :  { %v67_v21 = vld [vmem:[%s1442_s26] sm:$0x3] }
  0x15   :  { %v981_v5 = vpop.eup %980  ;;  %v68_v22 = vsub.f32 1.0, %v67_v21  ;;  %v978_v39 = vld [vmem:[%s1443_s4] ss:$0 sm:$0xff] }
  0x16   :  { %81 = vadd.xlane.f32.xlu0 %v80_v3  ;;  %v84_v6 = vmul.f32 32.0, %v981_v5  ;;  %vm88_vm1 = vweird.f32 %v981_v5  ;;  %v979_v42 = vld [vmem:[%s1444_s0] ss:$0 sm:$0xff] }
  0x17   :  { %v1206_v25 = vmul.f32 -10000.0, %v68_v22 }
  0x18   :  { %v85_v7 = vsub.f32 1.0, %v84_v6 }
  0x19   :  { %v71_v27 = vrot.slane %v1206_v25, 1 }
  0x1a   :  { %v86_v8 = vmul.f32 %v981_v5, %v85_v7 }
  0x1c   :  { %v87_v9 = vadd.f32 %v981_v5, %v86_v8 }
  0x1e   :  { %v1196_v10 = vsel %vm88_vm1, %v981_v5, %v87_v9 }
  0x81   :  { %v79_v11 = vpop.xlane.xlu0 %78 }
  0x82   :  { %v90_v12 = vmul.f32 %v1196_v10, %v79_v11 }
  0x84   :  { %v92_v13 = vsub.f32 %v72_v0, %v90_v12 }
  0x86   :  { %v94_v14 = vmul.f32 %v92_v13, %v92_v13 }
  0x88   :  { %v96_v15 = vsel %vm76_vm0, %v94_v14, 0.0 }
  0x89   :  { %97 = vadd.xlane.f32.xlu1 %v96_v15  ;;  %v82_v16 = vpop.xlane.xlu0 %81 }
  0x8a   :  { %v91_v17 = vmul.f32 %v1196_v10, %v82_v16 }
  0x8c   :  { %v93_v18 = vsub.f32 %v73_v2, %v91_v17 }
  0x8e   :  { %v95_v19 = vmul.f32 %v93_v18, %v93_v18 }
  0x90   :  { %v99_v20 = vsel %vm76_vm0, %v95_v19, 0.0 }
  0x91   :  { %100 = vadd.xlane.f32.xlu1 %v99_v20 }
  0xfc   :  { %v98_v23 = vpop.xlane.xlu1 %97 }
  0xfd   :  { %v102_v24 = vmul.f32 %v98_v23, %v1196_v10 }
  0xff   :  { %v104_v26 = vadd.f32 1e-12, %v102_v24 }
 0x101   :  { %982 = vrsqrt.f32 %v104_v26  ;;  %vm112_vm3 = vweird.f32 %v104_v26 }
 0x104   :  { %v101_v28 = vpop.xlane.xlu1 %100 }
 0x105   :  { %v103_v29 = vmul.f32 %v101_v28, %v1196_v10 }
 0x107   :  { %v983_v30 = vpop.eup %982  ;;  %v105_v31 = vadd.f32 1e-12, %v103_v29 }
 0x108   :  { %v107_v32 = vmul.f32 %v983_v30, %v104_v26  ;;  %vm113_vm2 = vweird.f32 %v983_v30 }
 0x109   :  { %984 = vrsqrt.f32 %v105_v31  ;;  %vm114_vm4 = vmor %vm112_vm3, %vm113_vm2  ;;  %vm122_vm6 = vweird.f32 %v105_v31 }
 0x10a   :  { %v108_v33 = vmul.f32 %v983_v30, %v107_v32 }
 0x10c   :  { %v109_v34 = vmul.f32 0.5, %v108_v33 }
 0x10e   :  { %v110_v35 = vsub.f32 1.5, %v109_v34 }
 0x10f   :  { %v985_v36 = vpop.eup %984 }
 0x110   :  { %v111_v37 = vmul.f32 %v983_v30, %v110_v35  ;;  %v117_v38 = vmul.f32 %v985_v36, %v105_v31  ;;  %vm123_vm5 = vweird.f32 %v985_v36 }
 0x111   :  { %vm124_vm7 = vmor %vm122_vm6, %vm123_vm5 }
 0x112   :  { %v115_v40 = vsel %vm114_vm4, %v983_v30, %v111_v37  ;;  %v118_v41 = vmul.f32 %v985_v36, %v117_v38 }
 0x113   :  { %v126_v43 = vmul.f32 %v115_v40, %v92_v13 }
 0x114   :  { %v119_v44 = vmul.f32 0.5, %v118_v41 }
 0x115   :  { %v131_v45 = vmul.f32 %v978_v39, %v126_v43 }
 0x116   :  { %v120_v46 = vsub.f32 1.5, %v119_v44 }
 0x117   :  { %v136_v47 = vadd.f32 %v979_v42, %v131_v45  }
 0x118   :  { %v121_v48 = vmul.f32 %v985_v36, %v120_v46 }
 0x11a   :  { %v125_v49 = vsel %vm124_vm7, %v985_v36, %v121_v48 }
 0x11b   :  { %v127_v50 = vmul.f32 %v125_v49, %v93_v18 }
 0x11d   :  { %v132_v51 = vmul.f32 %v978_v39, %v127_v50 }
 0x11f   :  { %v137_v52 = vadd.f32 %v979_v42, %v132_v51  }
 0x120 LB: > { %s1232_s1 = sshll.u32 %s1074_s21, 4  ;;  %s153_s24 = scalar_lea.vmem %s1419_s5, %s1074_s21  ;;  %v192_v55 = vpack.c.bf16 %v1066_v52, %v1070_v47  ;;  %vm236_vm8 = vcmask 130048   ;;  %v227_v14 = vperm.slane %v1206_v25, 0  ;;  %vm280_vm9 = vcmask 64512   ;;  %s1074_s21 = sphi %s1220_s21, %s143_s21   ;;  %v1070_v47 = vphi %v136_v47, %v1447_v47   ;;  %v1066_v52 = vphi %v137_v52, %v1446_v52  }
 0x121   : > { %s1445_s3 = sld [smem:[#allocation9_spill]]  ;;  %v986_v56 = vld [vmem:[%s153_s24] ss:$0 sm:$0xff]  ;;  %s1077_s27 = smov 112   ;;  %v228_v19 = vperm.slane %v71_v27, 0  ;;  %vm310_vm10 = vcmask 1043456  }
 0x122   : > { %s1078_s28 = smov 80   ;;  %s1079_s4 = smov 96   ;;  %vm650_vm2 = vcmask 523264  }
 0x123   : > { %s1080_s29 = smov 64   ;;  %s1081_s30 = smov 48  }
 0x124   : > { %s161_s23 = scalar_lea.vmem %s1421_s7, %s1074_s21  ;;  %s156_s25 = scalar_lea.vmem %s1420_s6, %s1232_s1 }
 0x125   : > { %s165_s0 = scalar_lea.vmem %s1423_s9, %s1074_s21  ;;  %s173_s24 = scalar_lea.vmem %s1425_s11, %s1074_s21 }
 0x126   : > { %s938_s22 = sshll.u32 %s1074_s21, 5 }
 0x127   : > { %s148_s26 = scalar_lea.vmem %s1445_s3, %s1232_s1  ;;  %s168_s3 = scalar_lea.vmem %s1424_s10, %s1232_s1 }
 0x128   : > { %v931_v53 = vld [vmem:[%s148_s26 + $0x8] sm:$0xff]  ;;  %v930_v54 = vld [vmem:[%s148_s26] sm:$0xff] }
 0x129   : > { %217 = vmatpush.bf16.msra.mxu0 %v931_v53 }
 0x12d   : > { %218 = vmatpush.bf16.msra.mxu0 %v930_v54 }
 0x130   : > { %866 = vmatmul.msk.bf16.vlgmr.msra.gmra.mxu0 %vm76_vm0, %v192_v55 }
 0x1ad   : > { %v220_v57 = vpop.f32.mrf.mxu0 }
 0x1ae   : > { %v221_v58 = vadd.f32 %v986_v56, %v220_v57 }
 0x1b0   : > { %v225_v59 = vpack.c.bf16 %v221_v58, %v221_v58 }
 0x1b2   : > { %v232_v60 = vunpack.c.l.b16 %v225_v59 }
 0x1b4   : > { %v1245_v61 = vpack.c.b16 %v232_v60, %v232_v60 }
 0x1b5   : > { %v222_v62 = vpop.f32.mrf.mxu0 }
 0x1b6   : > { %v223_v63 = vadd.f32 %v986_v56, %v222_v62  ;;  %377 = vrot.lane.b32.xlu2 %v1245_v61, %s1077_s27  ;;  %379 = vrot.lane.b32.xlu1 %v1245_v61, %s1078_s28 }
 0x1b7   : > { %234 = vrot.lane.b32.xlu0 %v1245_v61, %s1079_s4 }
 0x1b8   : > { %v226_v0 = vpack.c.bf16 %v223_v63, %v223_v63 }
 0x1ba   : > { %v257_v1 = vunpack.c.l.b16 %v226_v0 }
 0x1bc   : > { %v1250_v2 = vpack.c.b16 %v257_v1, %v257_v1 }
 0x1be   : > { %400 = vrot.lane.b32.xlu2 %v1250_v2, %s1077_s27  ;;  %402 = vrot.lane.b32.xlu1 %v1250_v2, %s1078_s28  ;;  %s188_s28 = scalar_lea.vmem %s1428_s14, %s1074_s21 }
 0x1bf   : > { %259 = vrot.lane.b32.xlu0 %v1250_v2, %s1079_s4  ;;  %s163_s4 = scalar_lea.vmem %s1422_s8, %s1074_s21 }
 0x210   : > { %v378_v12 = vpop.permute.xlu2 %377 }
 0x218   : > { %v401_v13 = vpop.permute.xlu2 %400 }
 0x228   : > { %v380_v3 = vpop.permute.xlu1 %379 }
 0x229   : > { %v235_v4 = vpop.permute.xlu0 %234  ;;  %v385_v5 = vsel %vm236_vm8, %v380_v3, 0 }
 0x22a   : > { %v241_v6 = vsel %vm236_vm8, %v235_v4, 0 }
 0x22b   : > { %250 = vmatpush.bf16.xpose.msra.mxu1 %v241_v6 }
 0x230   : > { %v403_v7 = vpop.permute.xlu1 %402 }
 0x231   : > { %v260_v8 = vpop.permute.xlu0 %259  ;;  %v408_v9 = vsel %vm236_vm8, %v403_v7, 0  ;;  %v933_v7 = vld [vmem:[%s156_s25] sm:$0xff] }
 0x232   : > { %867 = vmatmul.msk.bf16.vlgmr.msra.gmra.mxu1 %vm236_vm8, %v225_v59  ;;  %v265_v11 = vsel %vm236_vm8, %v260_v8, 0  ;;  %365 = vmatpush.bf16.msrb.mxu0 %v933_v7 }
 0x233   : > { %394 = vmatpush.bf16.xpose.msrb.mxu1 %v385_v5  ;;  %274 = vmatpush.bf16.xpose.msra.mxu2 %v265_v11 }
 0x23a   : > { %868 = vmatmul.msk.bf16.vlgmr.msra.gmra.mxu2 %vm236_vm8, %v226_v0 }
 0x23b   : > { %417 = vmatpush.bf16.xpose.msrb.mxu2 %v408_v9 }
 0x242   : > { %876 = vmatmul.msk.bf16.vlgmr.msrb.gmra.mxu1 %vm236_vm8, %v378_v12 }
 0x24a   : > { %877 = vmatmul.msk.bf16.vlgmr.msrb.gmra.mxu2 %vm236_vm8, %v401_v13 }
 0x2af   : > { %v252_v15 = vpop.f32.mrf.mxu1 }
 0x2b0   : > { %v253_v16 = vadd.f32 %v252_v15, %v227_v14 }
 0x2b2   : > { %v281_v17 = vsel %vm280_vm9, %v253_v16, -inf }
 0x2b3   : > { %282 = vmax.xlane.f32.xlu0 %v281_v17 }
 0x2b7   : > { %v254_v18 = vpop.f32.mrf.mxu1 }
 0x2bd   : > { %v276_v20 = vpop.f32.mrf.mxu2 }
 0x2be   : > { %v277_v21 = vadd.f32 %v276_v20, %v228_v19 }
 0x2bf   : > { %v396_v22 = vpop.f32.mrf.mxu1 }
 0x2c0   : > { %v397_v23 = vadd.f32 %v396_v22, %v227_v14  ;;  %v284_v24 = vsel %vm280_vm9, %v277_v21, -inf }
 0x2c1   : > { %285 = vmax.xlane.f32.xlu1 %v284_v24 }
 0x2c2   : > { %v423_v42 = vsel %vm280_vm9, %v397_v23, -inf }
 0x2c5   : > { %v278_v26 = vpop.f32.mrf.mxu2 }
 0x2c7   : > { %v398_v28 = vpop.f32.mrf.mxu1 }
 0x2cd   : > { %v419_v29 = vpop.f32.mrf.mxu2 }
 0x2ce   : > { %v420_v30 = vadd.f32 %v419_v29, %v228_v19 }
 0x2d0   : > { %v426_v43 = vsel %vm280_vm9, %v420_v30, -inf }
 0x2d5   : > { %v421_v31 = vpop.f32.mrf.mxu2 }
 0x2da   : > { %327 = vrot.lane.b32.xlu1 %v1250_v2, %s1080_s29 }
 0x2e2   : > { %447 = vrot.lane.b32.xlu1 %v1245_v61, %s1081_s30 }
 0x326   : > { %v283_v32 = vpop.xlane.xlu0 %282 }
 0x327   : > { %v287_v33 = vsub.f32 %v253_v16, %v283_v32 }
 0x329   : > { %v289_v34 = vmul.f32 1.442695, %v287_v33  ;;  %v987_v33 = vld [vmem:[%s161_s23] ss:$0 sm:$0xff] }
 0x32b   : > { %994 = vpow2.f32 %v289_v34 }
 0x331   : > { %v995_v35 = vpop.eup %994 }
 0x332   : > { %v293_v36 = vsel %vm280_vm9, %v995_v35, 0.0 }
 0x333   : > { %294 = vadd.xlane.f32.xlu2 %v293_v36 }
 0x334   : > { %v286_v37 = vpop.xlane.xlu1 %285 }
 0x335   : > { %v288_v38 = vsub.f32 %v277_v21, %v286_v37 }
 0x337   : > { %v291_v39 = vmul.f32 1.442695, %v288_v38 }
 0x339   : > { %996 = vpow2.f32 %v291_v39 }
 0x33f   : > { %v997_v40 = vpop.eup %996 }
 0x340   : > { %v296_v41 = vsel %vm280_vm9, %v997_v40, 0.0 }
 0x341   : > { %297 = vadd.xlane.f32.xlu0 %v296_v41 }
 0x349   : > { %424 = vmax.xlane.f32.xlu0 %v423_v42 }
 0x34b   : > { %305 = vrot.lane.b32.xlu2 %v1245_v61, %s1080_s29 }
 0x34c   : > { %v328_v44 = vpop.permute.xlu1 %327 }
 0x34d   : > { %v333_v53 = vsel %vm310_vm10, %v328_v44, 0 }
 0x351   : > { %427 = vmax.xlane.f32.xlu0 %v426_v43 }
 0x354   : > { %v448_v51 = vpop.permute.xlu1 %447 }
 0x355   : > { %v453_v55 = vsel %vm310_vm10, %v448_v51, 0 }
 0x3a6   : > { %v295_v45 = vpop.xlane.xlu2 %294 }
 0x3a7   : > { %998 = vrcp.f32 %v295_v45 }
 0x3ad   : > { %v999_v46 = vpop.eup %998 }
 0x3ae   : > { %v306_v48 = vpop.permute.xlu2 %305  ;;  %v301_v49 = vmul.f32 %v999_v46, %v995_v35 }
 0x3af   : > { %v312_v50 = vsel %vm310_vm10, %v306_v48, 0 }
 0x3b0   : > { %321 = vmatpush.bf16.msra.mxu3 %v312_v50  ;;  %v303_v54 = vpack.c.bf16 %v301_v49, %v301_v49 }
 0x3b3   : > { %869 = vmatmul.msk.bf16.vlgmr.msra.gmra.mxu3 %vm280_vm9, %v303_v54  ;;  %v937_v54 = vld [vmem:[%s168_s3 + $0x8] sm:$0xff] }
 0x3b4   : > { %342 = vmatpush.bf16.msrb.mxu3 %v333_v53  ;;  %v298_v56 = vpop.xlane.xlu0 %297  ;;  %596 = vmatpush.bf16.msra.mxu2 %v937_v54 }
 0x3b5   : > { %1000 = vrcp.f32 %v298_v56  ;;  %v936_v56 = vld [vmem:[%s168_s3] sm:$0xff] }
 0x3b8   : > { %462 = vmatpush.bf16.msra.mxu3 %v453_v55  ;;  %597 = vmatpush.bf16.msra.mxu2 %v936_v56 }
 0x3bb   : > { %v1001_v57 = vpop.eup %1000 }
 0x3bc   : > { %v425_v58 = vpop.xlane.xlu0 %424  ;;  %v302_v59 = vmul.f32 %v1001_v57, %v997_v40 }
 0x3bd   : > { %v429_v60 = vsub.f32 %v397_v23, %v425_v58  ;;  %v934_v23 = vld [vmem:[%s156_s25 + $0x8] sm:$0xff]  ;;  %s177_s25 = scalar_lea.vmem %s1426_s12, %s938_s22  ;;  %s190_s22 = scalar_lea.vmem %s1429_s15, %s1074_s21 }
 0x3be   : > { %v304_v62 = vpack.c.bf16 %v302_v59, %v302_v59  ;;  %506 = vmatpush.bf16.msra.mxu1 %v934_v23  ;;  %v941_v23 = vld [vmem:[%s177_s25 + $0x10] sm:$0xff] }
 0x3bf   : > { %v431_v61 = vmul.f32 1.442695, %v429_v60 }
 0x3c1   : > { %1002 = vpow2.f32 %v431_v61 }
 0x3c3   : > { %870 = vmatmul.msk.bf16.vlgmr.msrb.gmra.mxu3 %vm280_vm9, %v304_v62 }
 0x3c4   : > { %v428_v63 = vpop.xlane.xlu0 %427 }
 0x3c5   : > { %v430_v0 = vsub.f32 %v420_v30, %v428_v63 }
 0x3c7   : > { %v1003_v1 = vpop.eup %1002  ;;  %v433_v3 = vmul.f32 1.442695, %v430_v0 }
 0x3c8   : > { %v435_v4 = vsel %vm280_vm9, %v1003_v1, 0.0 }
 0x3c9   : > { %1004 = vpow2.f32 %v433_v3  ;;  %436 = vadd.xlane.f32.xlu2 %v435_v4 }
 0x3cf   : > { %v1005_v5 = vpop.eup %1004 }
 0x3d0   : > { %v438_v6 = vsel %vm280_vm9, %v1005_v5, 0.0 }
 0x3d1   : > { %439 = vadd.xlane.f32.xlu0 %v438_v6 }
 0x3e5   : > { %468 = vrot.lane.b32.xlu0 %v1250_v2, %s1081_s30  ;;  %s186_s30 = scalar_lea.vmem %s1427_s13, %s1074_s21  ;;  %s143_s21 = sadd.s32 1, %s1074_s21  }
 0x3e6   : > { %p140_p0 = scmp.ge.s32.totalorder %s143_s21, 2  }
 0x3e7   :  { %v945_v25 = vld [vmem:[%s1432_s18] sm:$0xff] (%p140_p0)  ;;  %s1082_s13 = smov (%p140_p0), [#allocation2]  }
 0x3e8   :  { %v1022_v27 = vld [vmem:[%s1431_s17] ss:$0 sm:$0xff] (%p140_p0)  ;;  %s814_s14 = sshll.u32 (%p140_p0), %s1082_s13, 4  ;;  %s815_s14 = int_to_ptr.vmem [resolvable:$true] %s814_s14 }
 0x436   : > { %v323_v8 = vpop.f32.mrf.mxu3 }
 0x43c   : > { %v437_v9 = vpop.xlane.xlu2 %436 }
 0x43d   : > { %1006 = vrcp.f32 %v437_v9 }
 0x43e   : > { %v325_v11 = vpop.f32.mrf.mxu3 }
 0x443   : > { %v1007_v12 = vpop.eup %1006 }
 0x444   : > { %v443_v13 = vmul.f32 %v1007_v12, %v1003_v1  ;;  %v440_v2 = vpop.xlane.xlu0 %439 }
 0x445   : > { %1008 = vrcp.f32 %v440_v2 }
 0x446   : > { %v445_v14 = vpack.c.bf16 %v443_v13, %v443_v13  ;;  %v344_v15 = vpop.f32.mrf.mxu3  ;;  %v988_v13 = vld [vmem:[%s163_s4] ss:$0 sm:$0xff] }
 0x447   : > { %v348_v16 = vpack.c.bf16 %v344_v15, %v323_v8 }
 0x448   : > { %878 = vmatmul.msk.bf16.vlgmr.msra.gmra.mxu3 %vm280_vm9, %v445_v14 }
 0x449   : > { %875 = vmatmul.msk.bf16.vlgmr.msrb.gmra.mxu0 %vm236_vm8, %v348_v16 }
 0x44b   : > { %v1009_v18 = vpop.eup %1008 }
 0x44c   : > { %v444_v19 = vmul.f32 %v1009_v18, %v1005_v5 }
 0x44e   : > { %v346_v17 = vpop.f32.mrf.mxu3  ;;  %v446_v22 = vpack.c.bf16 %v444_v19, %v444_v19 }
 0x44f   : > { %v989_v17 = vld [vmem:[%s165_s0] ss:$0 sm:$0xff] }
 0x457   : > { %v469_v20 = vpop.permute.xlu0 %468 }
 0x458   : > { %v474_v21 = vsel %vm310_vm10, %v469_v20, 0 }
 0x459   : > { %483 = vmatpush.bf16.msra.mxu0 %v474_v21 }
 0x45c   : > { %879 = vmatmul.msk.bf16.vlgmr.msra.gmra.mxu0 %vm280_vm9, %v446_v22  ;;  %v942_v22 = vld [vmem:[%s177_s25 + $0x18] sm:$0xff]  ;;  %vm739_vm9 = vcmask (%p140_p0), 1041409  }
 0x45d   : > { %658 = vmatpush.bf16.msrb.mxu3 %v942_v22  ;;  %v992_v22 = vld [vmem:[%s188_s28] ss:$0 sm:$0xff] }
 0x461   : > { %659 = vmatpush.bf16.msrb.mxu3 %v941_v23 }
 0x4c6   : > { %v367_v24 = vpop.f32.mrf.mxu0 }
 0x4c7   : > { %v375_v34 = vadd.f32 %v987_v33, %v367_v24  ;;  %v940_v24 = vld [vmem:[%s177_s25 + $0x8] sm:$0xff] }
 0x4c8   : > { %660 = vmatpush.bf16.msrb.mxu3 %v940_v24 }
 0x4cb   : > { %v464_v26 = vpop.f32.mrf.mxu3 }
 0x4ce   : > { %v369_v28 = vpop.f32.mrf.mxu0 }
 0x4cf   : > { %v376_v39 = vadd.f32 %v987_v33, %v369_v28  ;;  %v990_v28 = vld [vmem:[%s173_s24] ss:$0 sm:$0xff] }
 0x4d3   : > { %v466_v29 = vpop.f32.mrf.mxu3 }
 0x4d9   : > { %v485_v30 = vpop.f32.mrf.mxu0 }
 0x4da   : > { %v489_v31 = vpack.c.bf16 %v485_v30, %v464_v26  ;;  %v939_v26 = vld [vmem:[%s177_s25] sm:$0xff] }
 0x4db   : > { %661 = vmatpush.bf16.msrb.mxu3 %v939_v26  ;;  %v993_v26 = vld [vmem:[%s190_s22] ss:$0 sm:$0xff] }
 0x4dc   : > { %884 = vmatmul.msk.bf16.vlgmr.msra.gmra.mxu1 %vm236_vm8, %v489_v31 }
 0x4e1   : > { %v487_v32 = vpop.f32.mrf.mxu0 }
 0x559   : > { %v508_v35 = vpop.f32.mrf.mxu1 }
 0x55a   : > { %v513_v36 = vadd.f32 %v508_v35, %v375_v34 }
 0x55c   : > { %v515_v37 = vadd.f32 %v1070_v47, %v513_v36 }
 0x55e   : > { %v517_v38 = vsel %vm76_vm0, %v515_v37, 0.0 }
 0x55f   : > { %518 = vadd.xlane.f32.xlu1 %v517_v38 }
 0x561   : > { %v510_v40 = vpop.f32.mrf.mxu1 }
 0x562   : > { %v514_v41 = vadd.f32 %v510_v40, %v376_v39 }
 0x564   : > { %v516_v42 = vadd.f32 %v1066_v52, %v514_v41 }
 0x566   : > { %v520_v43 = vsel %vm76_vm0, %v516_v42, 0.0 }
 0x567   : > { %521 = vadd.xlane.f32.xlu0 %v520_v43 }
 0x5d2   : > { %v519_v44 = vpop.xlane.xlu1 %518 }
 0x5d3   : > { %v523_v45 = vmul.f32 %v519_v44, %v1196_v10 }
 0x5d5   : > { %v525_v46 = vsub.f32 %v515_v37, %v523_v45 }
 0x5d7   : > { %v527_v47 = vmul.f32 %v525_v46, %v525_v46 }
 0x5d9   : > { %v529_v48 = vsel %vm76_vm0, %v527_v47, 0.0 }
 0x5da   : > { %530 = vadd.xlane.f32.xlu2 %v529_v48  ;;  %v522_v49 = vpop.xlane.xlu0 %521 }
 0x5db   : > { %v524_v50 = vmul.f32 %v522_v49, %v1196_v10 }
 0x5dd   : > { %v526_v51 = vsub.f32 %v516_v42, %v524_v50 }
 0x5df   : > { %v528_v53 = vmul.f32 %v526_v51, %v526_v51 }
 0x5e1   : > { %v532_v52 = vsel %vm76_vm0, %v528_v53, 0.0  ;;  %v991_v53 = vld [vmem:[%s186_s30] ss:$0 sm:$0xff] }
 0x5e2   : > { %533 = vadd.xlane.f32.xlu2 %v532_v52 }
 0x64d   : > { %v531_v55 = vpop.xlane.xlu2 %530 }
 0x64e   : > { %v535_v57 = vmul.f32 %v531_v55, %v1196_v10 }
 0x650   : > { %v537_v58 = vadd.f32 1e-12, %v535_v57 }
 0x652   : > { %1010 = vrsqrt.f32 %v537_v58  ;;  %vm545_vm12 = vweird.f32 %v537_v58 }
 0x655   : > { %v534_v59 = vpop.xlane.xlu2 %533 }
 0x656   : > { %v536_v60 = vmul.f32 %v534_v59, %v1196_v10 }
 0x658   : > { %v1011_v61 = vpop.eup %1010  ;;  %v538_v62 = vadd.f32 1e-12, %v536_v60 }
 0x659   : > { %v540_v63 = vmul.f32 %v1011_v61, %v537_v58  ;;  %vm546_vm11 = vweird.f32 %v1011_v61 }
 0x65a   : > { %1012 = vrsqrt.f32 %v538_v62  ;;  %vm547_vm13 = vmor %vm545_vm12, %vm546_vm11  ;;  %vm555_vm15 = vweird.f32 %v538_v62 }
 0x65b   : > { %v541_v0 = vmul.f32 %v1011_v61, %v540_v63 }
 0x65d   : > { %v542_v1 = vmul.f32 0.5, %v541_v0 }
 0x65f   : > { %v543_v3 = vsub.f32 1.5, %v542_v1 }
 0x660   : > { %v1013_v4 = vpop.eup %1012 }
 0x661   : > { %v544_v5 = vmul.f32 %v1011_v61, %v543_v3  ;;  %v550_v6 = vmul.f32 %v1013_v4, %v538_v62  ;;  %vm556_vm14 = vweird.f32 %v1013_v4 }
 0x662   : > { %vm557_vm1 = vmor %vm555_vm15, %vm556_vm14 }
 0x663   : > { %v551_v7 = vmul.f32 %v1013_v4, %v550_v6  ;;  %v548_v8 = vsel %vm547_vm13, %v1011_v61, %v544_v5 }
 0x664   : > { %v559_v12 = vmul.f32 %v548_v8, %v525_v46 }
 0x665   : > { %v552_v9 = vmul.f32 0.5, %v551_v7 }
 0x666   : > { %v564_v2 = vmul.f32 %v988_v13, %v559_v12 }
 0x667   : > { %v553_v11 = vsub.f32 1.5, %v552_v9 }
 0x668   : > { %v569_v19 = vadd.f32 %v989_v17, %v564_v2 }
 0x669   : > { %v554_v14 = vmul.f32 %v1013_v4, %v553_v11 }
 0x66b   : > { %v558_v15 = vsel %vm557_vm1, %v1013_v4, %v554_v14 }
 0x66c   : > { %v560_v16 = vmul.f32 %v558_v15, %v526_v51 }
 0x66e   : > { %v565_v18 = vmul.f32 %v988_v13, %v560_v16 }
 0x670   : > { %v570_v20 = vadd.f32 %v989_v17, %v565_v18 }
 0x672   : > { %v571_v21 = vpack.c.bf16 %v570_v20, %v569_v19 }
 0x674   : > { %893 = vmatmul.msk.bf16.vlgmr.msra.gmra.mxu2 %vm76_vm0, %v571_v21 }
 0x6f7   : > { %v599_v29 = vpop.f32.mrf.mxu2 }
 0x6f8   : > { %v600_v30 = vadd.f32 %v990_v28, %v599_v29 }
 0x6fa   : > { %v606_v31 = vmul.f32 0.044715, %v600_v30  ;;  %v604_v46 = vmul.f32 0.5, %v600_v30 }
 0x6fc   : > { %v608_v32 = vmul.f32 %v606_v31, %v600_v30 }
 0x6fe   : > { %v610_v33 = vmul.f32 %v608_v32, %v600_v30 }
 0x6ff   : > { %v601_v34 = vpop.f32.mrf.mxu2 }
 0x700   : > { %v612_v35 = vadd.f32 %v610_v33, %v600_v30  ;;  %v602_v36 = vadd.f32 %v990_v28, %v601_v34 }
 0x702   : > { %v607_v37 = vmul.f32 0.044715, %v602_v36  ;;  %v614_v38 = vmul.f32 0.7978846, %v612_v35  ;;  %v605_v47 = vmul.f32 0.5, %v602_v36 }
 0x704   : > { %v609_v39 = vmul.f32 %v607_v37, %v602_v36  ;;  %1014 = vtanh.f32 %v614_v38  ;;  %v944_v38 = vld [vmem:[%s1430_s16 + $0x8] sm:$0xff] (%p140_p0) }
 0x705   :  { %763 = vmatpush.bf16.msra.mxu0 (%p140_p0), %v944_v38 }
 0x706   : > { %v611_v40 = vmul.f32 %v609_v39, %v602_v36 }
 0x708   : > { %v613_v41 = vadd.f32 %v611_v40, %v602_v36 }
 0x70a   : > { %v615_v42 = vmul.f32 0.7978846, %v613_v41  ;;  %v1015_v43 = vpop.eup %1014  ;;  %v943_v41 = vld [vmem:[%s1430_s16] sm:$0xff] (%p140_p0) }
 0x70b   : > { %v618_v44 = vadd.f32 1.0, %v1015_v43  ;;  %764 = vmatpush.bf16.msra.mxu0 (%p140_p0), %v943_v41 }
 0x70c   : > { %1016 = vtanh.f32 %v615_v42 }
 0x70d   : > { %v620_v49 = vmul.f32 %v618_v44, %v604_v46 }
 0x712   : > { %v1017_v45 = vpop.eup %1016 }
 0x713   : > { %v619_v48 = vadd.f32 1.0, %v1017_v45 }
 0x715   : > { %v621_v50 = vmul.f32 %v619_v48, %v605_v47 }
 0x717   : > { %v622_v51 = vpack.c.bf16 %v621_v50, %v620_v49 }
 0x719   : > { %910 = vmatmul.msk.bf16.vlgmr.msrb.gmra.mxu3 %vm650_vm2, %v622_v51 }
 0x79c   : > { %v663_v52 = vpop.f32.mrf.mxu3 }
 0x79d   : > { %v664_v54 = vadd.f32 %v991_v53, %v663_v52 }
 0x79f   : > { %v668_v55 = vadd.f32 %v664_v54, %v569_v19 }
 0x7a1   : > { %v670_v56 = vsel %vm76_vm0, %v668_v55, 0.0 }
 0x7a2   : > { %671 = vadd.xlane.f32.xlu1 %v670_v56 }
 0x7a4   : > { %v665_v57 = vpop.f32.mrf.mxu3 }
 0x7a5   : > { %v666_v58 = vadd.f32 %v991_v53, %v665_v57  ;;  %v1023_v53 = vld [vmem:[%s1433_s19] ss:$0 sm:$0xff] (%p140_p0) }
 0x7a7   : > { %v669_v59 = vadd.f32 %v666_v58, %v570_v20 }
 0x7a9   : > { %v673_v60 = vsel %vm76_vm0, %v669_v59, 0.0 }
 0x7aa   : > { %674 = vadd.xlane.f32.xlu2 %v673_v60 }
 0x815   : > { %v672_v61 = vpop.xlane.xlu1 %671 }
 0x816   : > { %v676_v62 = vmul.f32 %v672_v61, %v1196_v10 }
 0x818   : > { %v678_v63 = vsub.f32 %v668_v55, %v676_v62 }
 0x81a   : > { %v680_v0 = vmul.f32 %v678_v63, %v678_v63 }
 0x81c   : > { %v682_v1 = vsel %vm76_vm0, %v680_v0, 0.0 }
 0x81d   : > { %v675_v3 = vpop.xlane.xlu2 %674  ;;  %683 = vadd.xlane.f32.xlu1 %v682_v1 }
 0x81e   : > { %v677_v4 = vmul.f32 %v675_v3, %v1196_v10 }
 0x820   : > { %v679_v5 = vsub.f32 %v669_v59, %v677_v4 }
 0x822   : > { %v681_v6 = vmul.f32 %v679_v5, %v679_v5 }
 0x824   : > { %v685_v7 = vsel %vm76_vm0, %v681_v6, 0.0 }
 0x825   : > { %686 = vadd.xlane.f32.xlu2 %v685_v7 }
 0x890   : > { %v684_v8 = vpop.xlane.xlu1 %683 }
 0x891   : > { %v688_v9 = vmul.f32 %v684_v8, %v1196_v10 }
 0x893   : > { %v690_v11 = vadd.f32 1e-12, %v688_v9 }
 0x895   : > { %1018 = vrsqrt.f32 %v690_v11  ;;  %vm698_vm4 = vweird.f32 %v690_v11 }
 0x898   : > { %v687_v12 = vpop.xlane.xlu2 %686 }
 0x899   : > { %v689_v13 = vmul.f32 %v687_v12, %v1196_v10  ;;  %v946_v10 = vld [vmem:[%s1432_s18 + $0x8] sm:$0xff] (%p140_p0)  ;;  %s816_s18 = sshll.u32 (%p140_p0), %s1434_s20, 4  ;;  %s817_s18 = int_to_ptr.hbm [resolvable:$true] %s816_s18 }
 0x89a   :  { %801 = vmatpush.bf16.msra.mxu1 (%p140_p0), %v946_v10 }
 0x89b   : > { %v1019_v14 = vpop.eup %1018  ;;  %v691_v15 = vadd.f32 1e-12, %v689_v13 }
 0x89c   : > { %v693_v16 = vmul.f32 %v1019_v14, %v690_v11  ;;  %vm699_vm3 = vweird.f32 %v1019_v14 }
 0x89d   : > { %1020 = vrsqrt.f32 %v691_v15  ;;  %vm700_vm5 = vmor %vm698_vm4, %vm699_vm3  ;;  %vm708_vm7 = vweird.f32 %v691_v15 }
 0x89e   : > { %v694_v2 = vmul.f32 %v1019_v14, %v693_v16  ;;  %802 = vmatpush.bf16.msra.mxu1 (%p140_p0), %v945_v25 }
 0x8a0   : > { %v695_v17 = vmul.f32 0.5, %v694_v2 }
 0x8a2   : > { %v696_v18 = vsub.f32 1.5, %v695_v17 }
 0x8a3   : > { %v1021_v19 = vpop.eup %1020 }
 0x8a4   : > { %v697_v20 = vmul.f32 %v1019_v14, %v696_v18  ;;  %v703_v21 = vmul.f32 %v1021_v19, %v691_v15  ;;  %vm709_vm6 = vweird.f32 %v1021_v19 }
 0x8a5   : > { %vm710_vm8 = vmor %vm708_vm7, %vm709_vm6 }
 0x8a6   : > { %v701_v23 = vsel %vm700_vm5, %v1019_v14, %v697_v20  ;;  %v704_v24 = vmul.f32 %v1021_v19, %v703_v21 }
 0x8a7   : > { %v712_v28 = vmul.f32 %v701_v23, %v678_v63 }
 0x8a8   : > { %v705_v29 = vmul.f32 0.5, %v704_v24 }
 0x8a9   : > { %v717_v30 = vmul.f32 %v992_v22, %v712_v28 }
 0x8aa   : > { %v706_v31 = vsub.f32 1.5, %v705_v29 }
 0x8ab   : > { %v722_v32 = vadd.f32 %v993_v26, %v717_v30  }
 0x8ac   : > { %v707_v33 = vmul.f32 %v1021_v19, %v706_v31 }
 0x8ad   : > { %v1447_v47 = vmov %v722_v32  ;;  %v724_v39 = vpack.c.bf16 (%p140_p0), %v722_v32, %v722_v32 }
 0x8ae   : > { %v711_v34 = vsel %vm710_vm8, %v1021_v19, %v707_v33 }
 0x8af   : > { %v713_v35 = vmul.f32 %v711_v34, %v679_v5  ;;  %v736_v42 = vunpack.c.l.b16 (%p140_p0), %v724_v39 }
 0x8b1   : > { %v718_v36 = vmul.f32 %v992_v22, %v713_v35  ;;  %142 = sbr.rel (!%p140_p0) target bundleno = 288 (0x120), region = 119 }
 0x8b3   : > { %v723_v37 = vadd.f32 %v993_v26, %v718_v36  }
 0x8b5   : > { %v1446_v52 = vmov %v723_v37  ;;  %v725_v40 = vpack.c.bf16 (%p140_p0), %v723_v37, %v723_v37 }
 0x8b7   :  { %v737_v43 = vunpack.c.l.b16 %v725_v40 }
 0x8b9   :  { %v738_v44 = vrot.slane %v737_v43, 7 }
 0x8bb   :  { %v740_v45 = vsel %vm739_vm9, %v738_v44, %v736_v42 }
 0x8bc   :  { %v741_v46 = vpack.c.b16 %v740_v45, %v740_v45 }
 0x8be   :  { %919 = vmatmul.msk.bf16.vlgmr.msra.gmra.mxu0 %vm76_vm0, %v741_v46 }
 0x93b   :  { %v766_v47 = vpop.f32.mrf.mxu0 }
 0x93c   :  { %v767_v48 = vadd.f32 %v1022_v27, %v766_v47 }
 0x93e   :  { %1024 = vtanh.f32 %v767_v48 }
 0x943   :  { %v768_v49 = vpop.f32.mrf.mxu0 }
 0x944   :  { %v1025_v50 = vpop.eup %1024 }
 0x945   :  { %v771_v51 = vpack.c.bf16 %v1025_v50, %v1025_v50 }
 0x947   :  { %928 = vmatmul.msk.bf16.vlgmr.msra.gmra.mxu1 %vm76_vm0, %v771_v51 }
 0x9c4   :  { %v804_v52 = vpop.f32.mrf.mxu1 }
 0x9c5   :  { %v805_v54 = vadd.f32 %v1023_v53, %v804_v52 }
 0x9c7   :  { %808 = vst [vmem:[#allocation2] sm:$0x3] %v805_v54 }
 0x9c8   :  { %819 = dma.vmem_to_hbm [thread:$0]  %s815_s14, 32, %s817_s18, [#allocation3]  }
 0x9cc   :  { %v806_v55 = vpop.f32.mrf.mxu1 }
 0x9cd   :  { %1062 = dma.done.wait [#allocation3], 32  }
 0x9ce   :  { %1063 = vsyncadd [#allocation3], 4294967264 }
 0x9cf   :  { %824 = vsyncpa [#allocation3], 1 }

</bundles_post_ra>
